<compile_context>
chip_gen: v5e
topology: v5e:2x2
jax: 0.10.0
libtpu: 0.0.40
codegen_flags: <defaults>
</compile_context>

<pallas_src>
import functools

import jax
import jax.numpy as jnp
from jax.experimental import pallas as pl
from jax.experimental.pallas import tpu as pltpu


def _attention_kernel(out_ref, ctx_ref, mask_ref,
                      w_in_ref, w_out_ctx_ref, w_out_dec_ref, b_out_ref,
                      o_ref, attn_ref, *, compute_dtype, approx_reciprocal):
    q = out_ref[...]            # (Bb, Lq, D)  decoder hidden states (f32)
    c = ctx_ref[...]            # (Bb, Lk, 2E) encoder outputs       (f32)
    msk = mask_ref[...]         # (Bb, Lq, Lk) int8, nonzero == masked

    bb, lq, d = q.shape
    _, lk, e2 = c.shape

    qc = q.astype(compute_dtype)
    cc = c.astype(compute_dtype)

    # context_in = context @ W_in^T  -- batch flattened into the M dim (MXU fill),
    # weight already transposed in the wrapper (no in-kernel .T).
    c_in = jnp.dot(cc.reshape(bb * lk, e2), w_in_ref[...],
                   preferred_element_type=jnp.float32)              # (Bb*Lk, D)
    c_in = c_in.reshape(bb, lk, d)

    # attn scores = output @ context_in^T, expressed as a last-dim contraction
    # (no materialized transpose of context_in).
    scores = jnp.einsum("bqd,bkd->bqk", qc, c_in.astype(compute_dtype),
                        preferred_element_type=jnp.float32)          # (Bb, Lq, Lk)

    # masked_fill_(mask, -1e6): exact PyTorch semantics (incl. fully-masked rows).
    scores = jnp.where(msk != 0, jnp.float32(-1000000.0), scores)

    # softmax over keys, in f32.
    m = jnp.max(scores, axis=-1, keepdims=True)
    p = jnp.exp(scores - m)
    denom = jnp.sum(p, axis=-1, keepdims=True)
    attn = p * pl.reciprocal(denom, approx=approx_reciprocal)
    attn_ref[...] = attn.astype(attn_ref.dtype)

    # attended context = attn @ context
    ctx_att = jnp.einsum("bqk,bke->bqe", attn.astype(compute_dtype), cc,
                         preferred_element_type=jnp.float32)         # (Bb, Lq, 2E)

    # tanh([ctx_att, q] @ W_out^T + b) == tanh(ctx_att@Wc + q@Wd + b),
    # with the batch flattened into M and weights pre-transposed/split.
    pre = (jnp.dot(ctx_att.reshape(bb * lq, e2).astype(compute_dtype),
                   w_out_ctx_ref[...], preferred_element_type=jnp.float32)
           + jnp.dot(qc.reshape(bb * lq, d), w_out_dec_ref[...],
                     preferred_element_type=jnp.float32)
           + b_out_ref[...])
    o_ref[...] = jnp.tanh(pre).reshape(bb, lq, d).astype(o_ref.dtype)


def _pick_block_b(batch, lq, target_rows=256):
    """Largest divisor of `batch` keeping the packed M (= Bb*Lq) MXU-friendly,
    while leaving >= 2 grid steps whenever possible (v7x has 2 TensorCores)."""
    best = 1
    for bb in range(1, batch + 1):
        if batch % bb:
            continue
        if bb * lq > target_rows:
            break
        if batch // bb >= 2:
            best = bb
    return best


def attention_forward(output, context, mask, w_in, w_out, b_out, *,
                      compute_dtype=jnp.float32, approx_reciprocal=True,
                      block_b=None):
    """output: (B, Lq, D) f32, context: (B, Lk, 2E) f32, mask: (B, Lq, Lk) bool.
    w_in: (D, 2E), w_out: (D, 2E + D), b_out: (D,)  -- nn.Linear (out, in) layout."""
    B, Lq, D = output.shape
    _, Lk, E2 = context.shape

    # ---- glue: batch-invariant prep, done once in XLA (not per grid step) ----
    w_in_t = w_in.T.astype(compute_dtype)                  # (2E, D)
    w_out_ctx_t = w_out[:, :E2].T.astype(compute_dtype)    # (2E, D)
    w_out_dec_t = w_out[:, E2:].T.astype(compute_dtype)    # (D, D)
    b2 = b_out.reshape(1, D).astype(jnp.float32)           # added post-accum in f32
    mask_i8 = mask.astype(jnp.int8)                        # 4x less mask DMA vs f32

    if block_b is None:
        block_b = _pick_block_b(B, Lq)
    assert B % block_b == 0, (B, block_b)
    n_steps = B // block_b

    grid_spec = pltpu.PrefetchScalarGridSpec(
        num_scalar_prefetch=0,
        grid=(n_steps,),
        in_specs=[
            pl.BlockSpec((block_b, Lq, D), lambda b: (b, 0, 0)),
            pl.BlockSpec((block_b, Lk, E2), lambda b: (b, 0, 0)),
            pl.BlockSpec((block_b, Lq, Lk), lambda b: (b, 0, 0)),
            # batch-invariant weights / bias (constant index maps)
            pl.BlockSpec((E2, D), lambda b: (0, 0)),
            pl.BlockSpec((E2, D), lambda b: (0, 0)),
            pl.BlockSpec((D, D), lambda b: (0, 0)),
            pl.BlockSpec((1, D), lambda b: (0, 0)),
        ],
        out_specs=[
            pl.BlockSpec((block_b, Lq, D), lambda b: (b, 0, 0)),
            pl.BlockSpec((block_b, Lq, Lk), lambda b: (b, 0, 0)),
        ],
    )

    # Advisory cost estimate so XLA schedules around the custom call sensibly.
    flops = 2 * B * (Lk * E2 * D + Lq * D * Lk + Lq * Lk * E2 + Lq * (E2 + D) * D)
    transcendentals = B * Lq * (Lk + D)                     # exp + tanh
    wbytes = jnp.dtype(compute_dtype).itemsize
    bytes_accessed = (4 * (B * Lq * D + B * Lk * E2)        # f32 activations in
                      + B * Lq * Lk                         # int8 mask
                      + wbytes * (2 * E2 * D + D * D)       # weights
                      + 4 * D                               # bias
                      + 4 * (B * Lq * D + B * Lq * Lk))     # f32 outputs

    kernel = functools.partial(_attention_kernel,
                               compute_dtype=compute_dtype,
                               approx_reciprocal=approx_reciprocal)

    out, attn = pl.pallas_call(
        kernel,
        out_shape=(
            jax.ShapeDtypeStruct((B, Lq, D), jnp.float32),
            jax.ShapeDtypeStruct((B, Lq, Lk), jnp.float32),
        ),
        grid_spec=grid_spec,
        compiler_params=pltpu.CompilerParams(
            dimension_semantics=("parallel",)),
        cost_estimate=pl.CostEstimate(
            flops=flops,
            transcendentals=transcendentals,
            bytes_accessed=bytes_accessed),
    )(output, context, mask_i8, w_in_t, w_out_ctx_t, w_out_dec_t, b2)
    return out, attn


def _reference(output, context, mask, w_in, w_out, b_out):
    ctx_in = jnp.einsum("bke,de->bkd", context, w_in)
    attn = jnp.einsum("bqd,bkd->bqk", output, ctx_in)
    attn = jnp.where(mask, -1000000.0, attn)
    attn = jax.nn.softmax(attn, axis=2)
    ctx = jnp.einsum("bqk,bke->bqe", attn, context)
    cat = jnp.concatenate([ctx, output], axis=2)
    out = jnp.tanh(jnp.einsum("bqf,df->bqd", cat, w_out) + b_out[None, None, :])
    return out, attn


if __name__ == "__main__":
    B = 2
    enc_hidden = 16          # -> 2E = 32
    dec_hidden = 32          # D
    Lq = 8                   # output_len
    Lk = 8                   # input_len
    E2 = enc_hidden * 2

    key = jax.random.PRNGKey(0)
    k1, k2, k3, k4, k5, k6 = jax.random.split(key, 6)

    output = jax.random.normal(k1, (B, Lq, dec_hidden), dtype=jnp.float32)
    context = jax.random.normal(k2, (B, Lk, E2), dtype=jnp.float32)
    mask = jax.random.bernoulli(k3, p=0.3, shape=(B, Lq, Lk))

    # deterministic "parameters" (nn.Linear layout: weight is (out, in))
    w_in = jax.random.normal(k4, (dec_hidden, E2), dtype=jnp.float32) * 0.1
    w_out = jax.random.normal(k5, (dec_hidden, E2 + dec_hidden), dtype=jnp.float32) * 0.1
    b_out = jax.random.normal(k6, (dec_hidden,), dtype=jnp.float32) * 0.1

    out_ref, attn_ref = _reference(output, context, mask, w_in, w_out, b_out)

    # 1) f32 operands, auto batch-blocking (keeps >= 2 parallel grid steps for
    #    v7x megacore), exact reciprocal -> strict tolerance.
    out1, attn1 = attention_forward(output, context, mask, w_in, w_out, b_out,
                                    compute_dtype=jnp.float32,
                                    approx_reciprocal=False)
    jax.block_until_ready(out1)
    jax.block_until_ready(attn1)
    assert jnp.allclose(out1, out_ref, atol=1e-5, rtol=1e-5), "f32 output mismatch"
    assert jnp.allclose(attn1, attn_ref, atol=1e-5, rtol=1e-5), "f32 attn mismatch"

    # 2) f32, all batches packed into a single grid step (MXU-fill config).
    out2, attn2 = attention_forward(output, context, mask, w_in, w_out, b_out,
                                    compute_dtype=jnp.float32,
                                    approx_reciprocal=False,
                                    block_b=B)
    jax.block_until_ready(out2)
    assert jnp.allclose(out2, out_ref, atol=1e-5, rtol=1e-5), "packed output mismatch"
    assert jnp.allclose(attn2, attn_ref, atol=1e-5, rtol=1e-5), "packed attn mismatch"

    # 3) bf16 MXU operands + f32 accumulation + approx (EUP) reciprocal:
    #    the v6e/v7x throughput configuration -> looser tolerance.
    out3, attn3 = attention_forward(output, context, mask, w_in, w_out, b_out,
                                    compute_dtype=jnp.bfloat16,
                                    approx_reciprocal=True,
                                    block_b=B)
    jax.block_until_ready(out3)
    assert jnp.allclose(out3, out_ref, atol=5e-2, rtol=5e-2), "bf16 output mismatch"
    assert jnp.allclose(attn3, attn_ref, atol=5e-2, rtol=5e-2), "bf16 attn mismatch"

    print("KERNEL_OK")
</pallas_src>

<mosaic_0001>
module attributes {stable_mosaic.version = 11 : i64} {
  func.func @_attention_kernel(%arg0: i32, %arg1: memref<1x8x32xf32, #tpu.memory_space<vmem>>, %arg2: memref<1x8x32xf32, #tpu.memory_space<vmem>>, %arg3: memref<1x8x8xi8, #tpu.memory_space<vmem>>, %arg4: memref<32x32xf32, #tpu.memory_space<vmem>>, %arg5: memref<32x32xf32, #tpu.memory_space<vmem>>, %arg6: memref<32x32xf32, #tpu.memory_space<vmem>>, %arg7: memref<1x32xf32, #tpu.memory_space<vmem>>, %arg8: memref<1x8x32xf32, #tpu.memory_space<vmem>>, %arg9: memref<1x8x8xf32, #tpu.memory_space<vmem>>) attributes {dimension_semantics = [#tpu.dimension_semantics<parallel>], iteration_bounds = array<i64: 2>, scalar_prefetch = 0 : i64, scratch_operands = 0 : i64, tpu.core_type = #tpu.core_type<tc>, window_params = [{transform_indices = @transform_0, window_bounds = array<i64: 1, 8, 32>}, {transform_indices = @transform_1, window_bounds = array<i64: 1, 8, 32>}, {transform_indices = @transform_2, window_bounds = array<i64: 1, 8, 8>}, {pipeline_mode = #tpu.pipeline_mode<synchronous>, transform_indices = @transform_3, window_bounds = array<i64: 32, 32>}, {pipeline_mode = #tpu.pipeline_mode<synchronous>, transform_indices = @transform_4, window_bounds = array<i64: 32, 32>}, {pipeline_mode = #tpu.pipeline_mode<synchronous>, transform_indices = @transform_5, window_bounds = array<i64: 32, 32>}, {pipeline_mode = #tpu.pipeline_mode<synchronous>, transform_indices = @transform_6, window_bounds = array<i64: 1, 32>}, {transform_indices = @transform_7, window_bounds = array<i64: 1, 8, 32>}, {transform_indices = @transform_8, window_bounds = array<i64: 1, 8, 8>}]} {
    %c0 = arith.constant 0 : index
    %c0_0 = arith.constant 0 : index
    %c0_1 = arith.constant 0 : index
    %0 = vector.load %arg1[%c0, %c0_0, %c0_1] : memref<1x8x32xf32, #tpu.memory_space<vmem>>, vector<1x8x32xf32>
    %c0_2 = arith.constant 0 : index
    %c0_3 = arith.constant 0 : index
    %c0_4 = arith.constant 0 : index
    %1 = vector.load %arg2[%c0_2, %c0_3, %c0_4] : memref<1x8x32xf32, #tpu.memory_space<vmem>>, vector<1x8x32xf32>
    %c0_5 = arith.constant 0 : index
    %c0_6 = arith.constant 0 : index
    %c0_7 = arith.constant 0 : index
    %2 = vector.load %arg3[%c0_5, %c0_6, %c0_7] : memref<1x8x8xi8, #tpu.memory_space<vmem>>, vector<1x8x8xi8>
    %3 = vector.shape_cast %1 : vector<1x8x32xf32> to vector<8x32xf32>
    %c0_8 = arith.constant 0 : index
    %c0_9 = arith.constant 0 : index
    %4 = vector.load %arg4[%c0_8, %c0_9] : memref<32x32xf32, #tpu.memory_space<vmem>>, vector<32x32xf32>
    %cst = arith.constant dense<0.000000e+00> : vector<8x32xf32>
    %5 = tpu.matmul %3, %4, %cst {dimension_numbers = #tpu.dot_dimension_numbers<[1], [0], [0], [1], [0, 0, 1, 1], [], []>} : vector<8x32xf32>, vector<32x32xf32>, vector<8x32xf32> -> vector<8x32xf32>
    %6 = vector.shape_cast %5 : vector<8x32xf32> to vector<1x8x32xf32>
    "tpu.trace_start"() <{level = 10 : i32, message = "bqd,bkd->bqk"}> : () -> ()
    %cst_10 = arith.constant dense<0.000000e+00> : vector<1x8x8xf32>
    %7 = tpu.matmul %0, %6, %cst_10 {dimension_numbers = #tpu.dot_dimension_numbers<[2], [2], [1], [1], [0, 0, 0, 1, 1, 1], [0], [0]>} : vector<1x8x32xf32>, vector<1x8x32xf32>, vector<1x8x8xf32> -> vector<1x8x8xf32>
    %c0_i8 = arith.constant 0 : i8
    "tpu.trace_stop"() : () -> ()
    %8 = vector.broadcast %c0_i8 : i8 to vector<1x8x8xi8>
    %9 = arith.cmpi ne, %2, %8 : vector<1x8x8xi8>
    %cst_11 = arith.constant -1.000000e+06 : f32
    %10 = vector.broadcast %cst_11 : f32 to vector<1x8x8xf32>
    %11 = arith.select %9, %10, %7 : vector<1x8x8xi1>, vector<1x8x8xf32>
    %cst_12 = arith.constant dense<0xFF800000> : vector<1x8xf32>
    %12 = vector.multi_reduction <maximumf>, %11, %cst_12 [2] : vector<1x8x8xf32> to vector<1x8xf32>
    %13 = vector.shape_cast %12 : vector<1x8xf32> to vector<1x8x1xf32>
    %14 = vector.broadcast %13 : vector<1x8x1xf32> to vector<1x8x8xf32>
    %15 = arith.subf %11, %14 : vector<1x8x8xf32>
    %16 = math.exp %15 : vector<1x8x8xf32>
    %cst_13 = arith.constant dense<0.000000e+00> : vector<1x8xf32>
    %17 = vector.multi_reduction <add>, %16, %cst_13 [2] : vector<1x8x8xf32> to vector<1x8xf32>
    %18 = vector.shape_cast %17 : vector<1x8xf32> to vector<1x8x1xf32>
    %19 = tpu.reciprocal %18 : vector<1x8x1xf32> -> vector<1x8x1xf32>
    %20 = vector.broadcast %19 : vector<1x8x1xf32> to vector<1x8x8xf32>
    %21 = arith.mulf %16, %20 : vector<1x8x8xf32>
    %c0_14 = arith.constant 0 : index
    %c0_15 = arith.constant 0 : index
    %c0_16 = arith.constant 0 : index
    %22 = vector.load %arg9[%c0_14, %c0_15, %c0_16] : memref<1x8x8xf32, #tpu.memory_space<vmem>>, vector<1x8x8xf32>
    tpu.vector_store %arg9[%c0_14, %c0_15, %c0_16], %21 {strides = array<i32>} : memref<1x8x8xf32, #tpu.memory_space<vmem>>, vector<1x8x8xf32>,
    "tpu.trace_start"() <{level = 10 : i32, message = "bqk,bke->bqe"}> : () -> ()
    %cst_17 = arith.constant dense<0.000000e+00> : vector<1x8x32xf32>
    %23 = tpu.matmul %21, %1, %cst_17 {dimension_numbers = #tpu.dot_dimension_numbers<[2], [1], [1], [2], [0, 0, 0, 1, 1, 2], [0], [0]>} : vector<1x8x8xf32>, vector<1x8x32xf32>, vector<1x8x32xf32> -> vector<1x8x32xf32>
    "tpu.trace_stop"() : () -> ()
    %24 = vector.shape_cast %23 : vector<1x8x32xf32> to vector<8x32xf32>
    %c0_18 = arith.constant 0 : index
    %c0_19 = arith.constant 0 : index
    %25 = vector.load %arg5[%c0_18, %c0_19] : memref<32x32xf32, #tpu.memory_space<vmem>>, vector<32x32xf32>
    %cst_20 = arith.constant dense<0.000000e+00> : vector<8x32xf32>
    %26 = tpu.matmul %24, %25, %cst_20 {dimension_numbers = #tpu.dot_dimension_numbers<[1], [0], [0], [1], [0, 0, 1, 1], [], []>} : vector<8x32xf32>, vector<32x32xf32>, vector<8x32xf32> -> vector<8x32xf32>
    %27 = vector.shape_cast %0 : vector<1x8x32xf32> to vector<8x32xf32>
    %c0_21 = arith.constant 0 : index
    %c0_22 = arith.constant 0 : index
    %28 = vector.load %arg6[%c0_21, %c0_22] : memref<32x32xf32, #tpu.memory_space<vmem>>, vector<32x32xf32>
    %cst_23 = arith.constant dense<0.000000e+00> : vector<8x32xf32>
    %29 = tpu.matmul %27, %28, %cst_23 {dimension_numbers = #tpu.dot_dimension_numbers<[1], [0], [0], [1], [0, 0, 1, 1], [], []>} : vector<8x32xf32>, vector<32x32xf32>, vector<8x32xf32> -> vector<8x32xf32>
    %30 = arith.addf %26, %29 : vector<8x32xf32>
    %c0_24 = arith.constant 0 : index
    %c0_25 = arith.constant 0 : index
    %31 = vector.load %arg7[%c0_24, %c0_25] : memref<1x32xf32, #tpu.memory_space<vmem>>, vector<1x32xf32>
    %32 = vector.broadcast %31 : vector<1x32xf32> to vector<8x32xf32>
    %33 = arith.addf %30, %32 : vector<8x32xf32>
    %34 = math.tanh %33 : vector<8x32xf32>
    %35 = vector.shape_cast %34 : vector<8x32xf32> to vector<1x8x32xf32>
    %c0_26 = arith.constant 0 : index
    %c0_27 = arith.constant 0 : index
    %c0_28 = arith.constant 0 : index
    %36 = vector.load %arg8[%c0_26, %c0_27, %c0_28] : memref<1x8x32xf32, #tpu.memory_space<vmem>>, vector<1x8x32xf32>
    tpu.vector_store %arg8[%c0_26, %c0_27, %c0_28], %35 {strides = array<i32>} : memref<1x8x32xf32, #tpu.memory_space<vmem>>, vector<1x8x32xf32>,
    return
  }
  func.func @transform_0(%arg0: i32) -> (i32, i32, i32) {
    %c0_i32 = arith.constant 0 : i32
    %c0_i32_0 = arith.constant 0 : i32
    %c0_i32_1 = arith.constant 0 : i32
    return %arg0, %c0_i32, %c0_i32_0 : i32, i32, i32
  }
  func.func @transform_1(%arg0: i32) -> (i32, i32, i32) {
    %c0_i32 = arith.constant 0 : i32
    %c0_i32_0 = arith.constant 0 : i32
    %c0_i32_1 = arith.constant 0 : i32
    return %arg0, %c0_i32, %c0_i32_0 : i32, i32, i32
  }
  func.func @transform_2(%arg0: i32) -> (i32, i32, i32) {
    %c0_i32 = arith.constant 0 : i32
    %c0_i32_0 = arith.constant 0 : i32
    %c0_i32_1 = arith.constant 0 : i32
    return %arg0, %c0_i32, %c0_i32_0 : i32, i32, i32
  }
  func.func @transform_3(%arg0: i32) -> (i32, i32) {
    %c0_i32 = arith.constant 0 : i32
    %c0_i32_0 = arith.constant 0 : i32
    %c0_i32_1 = arith.constant 0 : i32
    return %c0_i32, %c0_i32_0 : i32, i32
  }
  func.func @transform_4(%arg0: i32) -> (i32, i32) {
    %c0_i32 = arith.constant 0 : i32
    %c0_i32_0 = arith.constant 0 : i32
    %c0_i32_1 = arith.constant 0 : i32
    return %c0_i32, %c0_i32_0 : i32, i32
  }
  func.func @transform_5(%arg0: i32) -> (i32, i32) {
    %c0_i32 = arith.constant 0 : i32
    %c0_i32_0 = arith.constant 0 : i32
    %c0_i32_1 = arith.constant 0 : i32
    return %c0_i32, %c0_i32_0 : i32, i32
  }
  func.func @transform_6(%arg0: i32) -> (i32, i32) {
    %c0_i32 = arith.constant 0 : i32
    %c0_i32_0 = arith.constant 0 : i32
    %c0_i32_1 = arith.constant 0 : i32
    return %c0_i32, %c0_i32_0 : i32, i32
  }
  func.func @transform_7(%arg0: i32) -> (i32, i32, i32) {
    %c0_i32 = arith.constant 0 : i32
    %c0_i32_0 = arith.constant 0 : i32
    %c0_i32_1 = arith.constant 0 : i32
    return %arg0, %c0_i32, %c0_i32_0 : i32, i32, i32
  }
  func.func @transform_8(%arg0: i32) -> (i32, i32, i32) {
    %c0_i32 = arith.constant 0 : i32
    %c0_i32_0 = arith.constant 0 : i32
    %c0_i32_1 = arith.constant 0 : i32
    return %arg0, %c0_i32, %c0_i32_0 : i32, i32, i32
  }
}

</mosaic_0001>

<bundles_post_ra>
// kernel: tpu_custom_call.1
= control target key start
LH: loop header
LB: loop body
LE: loop exit
PB: predicated region body
PF: predicated region fallthrough
CT: control target
= control target key end

     0   :  { %s1572_s0 = inlined_call_operand.hbm [shape: f32[2,8,32], index: 0, kind: input, shape index: {}]   ;;  %s1573_s1 = inlined_call_operand.hbm [shape: f32[2,8,32], index: 1, kind: input, shape index: {}]   ;;  %s1574_s2 = inlined_call_operand.hbm [shape: s8[2,8,8], index: 2, kind: input, shape index: {}]   ;;  %s1575_s3 = inlined_call_operand.hbm [shape: f32[32,32], index: 3, kind: input, shape index: {}]   ;;  %s1576_s4 = inlined_call_operand.hbm [shape: f32[32,32], index: 4, kind: input, shape index: {}]   ;;  %s1577_s5 = inlined_call_operand.hbm [shape: f32[32,32], index: 5, kind: input, shape index: {}]   ;;  %s1578_s6 = inlined_call_operand.vmem [shape: f32[1,32], index: 6, kind: input, shape index: {}]   ;;  %s1579_s7 = inlined_call_operand.hbm [shape: f32[2,8,32], index: 7, kind: output, shape index: {0}]   ;;  %s1580_s8 = inlined_call_operand.hbm [shape: f32[2,8,8], index: 8, kind: output, shape index: {1}]  }
   0x1   :  { %1593 = sst [smem:[#allocation27_spill]] %s1573_s1 }
   0x2   :  { %1594 = sst [smem:[#allocation28_spill]] %s1575_s3 }
   0x3   :  { %1595 = sst [smem:[#allocation29_spill]] %s1579_s7 }
   0x4   :  { %14 = vsyncpa [#allocation3], 0 }
   0x5   :  { %16 = vsyncpa [#allocation3 + $0x1], 0 }
   0x6   :  { %17 = vsyncpa [#allocation6], 0 }
   0x7   :  { %19 = vsyncpa [#allocation6 + $0x1], 0 }
   0x8   :  { %20 = vsyncpa [#allocation9], 0 }
   0x9   :  { %21 = vsyncpa [#allocation12], 0 }
   0xa   :  { %22 = vsyncpa [#allocation4], 0 }
   0xb   :  { %24 = vsyncpa [#allocation4 + $0x1], 0 }
   0xc   :  { %25 = vsyncpa [#allocation15], 0 }
   0xd   :  { %27 = vsyncpa [#allocation15 + $0x1], 0  ;;  %s1318_s27 = smov 0   ;;  %s1320_s28 = smov 0  }
   0xe   :  { %s1322_s29 = smov 0   ;;  %s1324_s30 = smov 0  }
   0xf LB: > { %1596 = sst [smem:[#allocation22_spill]] %s1253_s27  ;;  %s1342_s12 = sadd.s32 4294967295, %s1265_s30   ;;  %s1265_s30 = sphi %s1324_s30, %s1620_s30   ;;  %s1261_s29 = sphi %s1322_s29, %s1622_s29   ;;  %s1257_s28 = sphi %s1320_s28, %s1624_s28   ;;  %s1253_s27 = sphi %s1318_s27, %s1623_s27  }
  0x10   : > { %1597 = sst [smem:[#allocation23_spill]] %s1261_s29  ;;  %p841_p0 = scmp.ge.s32.totalorder %s1265_s30, 1 }
  0x11   : > { %s1598_s3 = sld [smem:[#allocation28_spill]]  ;;  %p1592_p1 = scmp.eq.s32.totalorder %s1342_s12, 0 }
  0x12   : > { %p252_p2 = scmp.lt.s32.totalorder %s1265_s30, 3  ;;  %s1267_s14 = smov [#allocation8]  }
  0x13   : > { %s265_s15 = sshll.u32 %s1267_s14, 4  ;;  %s1581_s17 = smov 128   ;;  %s266_s15 = int_to_ptr.vmem [resolvable:$true] %s265_s15 }
  0x14   : > { %p1347_p3 = pnand %p841_p0, %p252_p2  ;;  %s1583_s18 = smov 8  }
  0x15   : > { %s840_s19 = sadd.s32 4294967294, %s1265_s30   ;;  %s1367_s20 = sadd.s32 1, %s1265_s30  }
  0x16   : > { %p895_p4 = pneg %p1347_p3  ;;  %1601 = sst [smem:[#allocation24_spill]] %s1367_s20 }
  0x17   : > { %s263_s11 = sshll.u32 %s1598_s3, 4  ;;  %s40_s21 = sadd.s32 1, %s1261_s29  ;;  %s264_s11 = int_to_ptr.hbm [resolvable:$true] %s263_s11 }
  0x18   : > { %p1356_p6 = pnand %p895_p4, %p1592_p1  ;;  %s37_s22 = ssub.s32 %s1265_s30, %s1367_s20 }
  0x19   : > { %p47_p7 = scmp.ne.s32.totalorder %s1261_s29, %s1257_s28  ;;  %p38_p8 = scmp.eq.s32.totalorder %s37_s22, 0 }
  0x1a   : > { %898 = dma.hbm_to_vmem [thread:$0]  (!%p1356_p6), %s264_s11, 512, %s266_s15, [#allocation9], %s1581_s17, %s1581_s17, %s1583_s18  }
  0x1b   : > { %p48_p9 = scmp.eq.s32.totalorder %s1265_s30, 0  ;;  %p53_p10 = scmp.ne.s32.totalorder %s1257_s28, %s1253_s27 }
  0x1c   : > { %p213_p11 = scmp.eq.s32.totalorder %s1342_s12, 1  ;;  %p219_p2 = scmp.eq.s32.totalorder %s840_s19, 1 }
  0x1d   : > { %s1379_s23 = scalar_select %p38_p8, %s1261_s29, %s40_s21  }
  0x1e   : > { %p49_p12 = por %p48_p9, %p47_p7  ;;  %p1383_p13 = por %p1592_p1, %p53_p10 }
  0x1f   : > { %1602 = sst [smem:[#allocation25_spill]] %s1379_s23  ;;  %p1387_p0 = por %p213_p11, %p47_p7 }
  0x20   : > { %p925_p4 = scmp.lt.s32.totalorder %s1265_s30, 2  ;;  %s1393_s26 = sand.u32 1, %s1261_s29  }
  0x21   : > { %p1395_p5 = por %p219_p2, %p53_p10  ;;  %s1591_s10 = sshll.u32 %s1393_s26, 3 }
  0x22   : > { %s847_s11 = sshll.u32 %s1265_s30, 3  ;;  %p1401_p8 = pnand %p925_p4, %p49_p12 }
  0x23   : > { %s1605_s9 = scalar_select %p1395_p5, 1, 0 }
  0x24   : > { %s329_s15 = sand.u32 1, %s1265_s30   ;;  %s1608_s1 = sld [smem:[#allocation27_spill]] }
  0x25   : > { %1606 = sst [smem:[#allocation26_spill]] %s1605_s9  ;;  %s333_s17 = scalar_lea.vmem [#allocation5], %s1591_s10 }
  0x26   : > { %s341_s18 = sshll.u32 %s333_s17, 4  ;;  %s277_s20 = sshll.u32 %s1576_s4, 4  ;;  %s342_s18 = int_to_ptr.vmem [resolvable:$true] %s341_s18  ;;  %s278_s20 = int_to_ptr.hbm [resolvable:$true] %s277_s20 }
  0x27   : > { %s1416_s9 = scalar_lea.sflag [#allocation6], %s329_s15  ;;  %p1009_p9 = pneg %p1401_p8 }
  0x2a   : > { %s337_s22 = scalar_lea.hbm %s1608_s1, %s847_s11  ;;  %s1012_s21 = scalar_lea.hbm %s1608_s1, 16 }
  0x2b   : > { %s339_s3 = sshll.u32 %s337_s22, 4  ;;  %s340_s3 = int_to_ptr.hbm [resolvable:$true] %s339_s3 }
  0x2c   : > { %s1005_s27 = sshra.s32 %s340_s3, 4  ;;  %s1006_s27 = int_to_ptr.hbm [resolvable:$true] %s1005_s27 }
  0x2d   : > { %s1007_s7 = scalar_lea.hbm %s1006_s27, 8  ;;  %p1013_p12 = scmp.lt.s32.totalorder %s1006_s27, %s1608_s1 }
  0x2e   : > { %p1008_p7 = scmp.ne.s32.totalorder %s1006_s27, %s1007_s7  ;;  %p1014_p2 = scmp.lt.s32.totalorder %s1012_s21, %s1007_s7 }
  0x30   : > { %p1010_p10 = pnand %p1009_p9, %p1008_p7  ;;  %p1015_p4 = por %p1014_p2, %p1013_p12 }
  0x32   : > { %p1011_p11 = pneg %p1010_p10 }
  0x34   : > { %p1016_p1 = pnand %p1015_p4, %p1011_p11 }
  0x36   : > { %1019 = shalt.err (!%p1016_p1)
}
  0x37   : > { %911 = dma.hbm_to_vmem [thread:$0]  (!%p1401_p8), %s340_s3, 128, %s342_s18, %s1416_s9  }
  0x38   : > { %s1270_s29 = smov [#allocation10]   ;;  %s291_s27 = sshll.u32 %s1577_s5, 4  ;;  %s292_s27 = int_to_ptr.hbm [resolvable:$true] %s291_s27 }
  0x39   : > { %s279_s23 = sshll.u32 %s1270_s29, 4  ;;  %s1609_s7 = smov 8   ;;  %s280_s23 = int_to_ptr.vmem [resolvable:$true] %s279_s23 }
  0x3a   : > { %s1610_s10 = smov 128   ;;  %s1271_s19 = smov [#allocation11]  }
  0x3b   : > { %901 = dma.hbm_to_vmem [thread:$0]  (!%p1356_p6), %s278_s20, 512, %s280_s23, [#allocation9], %s1610_s10, %s1610_s10, %s1609_s7  }
  0x3c   : > { %s293_s21 = sshll.u32 %s1271_s19, 4  ;;  %s318_s22 = scalar_lea.hbm %s1572_s0, %s847_s11  ;;  %s294_s21 = int_to_ptr.vmem [resolvable:$true] %s293_s21 }
  0x3d   : > { %904 = dma.hbm_to_vmem [thread:$0]  (!%p1356_p6), %s292_s27, 512, %s294_s21, [#allocation12], %s1610_s10, %s1610_s10, %s1609_s7  }
  0x3e   : > { %s320_s29 = sshll.u32 %s318_s22, 4  ;;  %s1611_s15 = sshll.u32 %s1393_s26, 3  ;;  %s321_s29 = int_to_ptr.hbm [resolvable:$true] %s320_s29 }
  0x3f   : > { %s314_s17 = scalar_lea.vmem [#allocation2], %s1611_s15  ;;  %s311_s20 = scalar_lea.sflag [#allocation3], %s1393_s26 }
  0x40   : > { %s322_s1 = sshll.u32 %s314_s17, 4  ;;  %s1095_s23 = sshra.s32 %s321_s29, 4  ;;  %s323_s1 = int_to_ptr.vmem [resolvable:$true] %s322_s1  ;;  %s1096_s23 = int_to_ptr.hbm [resolvable:$true] %s1095_s23 }
  0x41   : > { %s1097_s19 = scalar_lea.hbm %s1096_s23, 8  ;;  %s1102_s3 = scalar_lea.hbm %s1572_s0, 16 }
  0x42   : > { %p1098_p1 = scmp.ne.s32.totalorder %s1096_s23, %s1097_s19  ;;  %p1103_p6 = scmp.lt.s32.totalorder %s1096_s23, %s1572_s0 }
  0x43   : > { %p1104_p11 = scmp.lt.s32.totalorder %s1102_s3, %s1097_s19 }
  0x44   : > { %p1100_p7 = pnand %p1098_p1, %p1009_p9 }
  0x45   : > { %p1105_p12 = por %p1104_p11, %p1103_p6 }
  0x46   : > { %p1101_p10 = pneg %p1100_p7 }
  0x48   : > { %p1106_p2 = pnand %p1105_p12, %p1101_p10 }
  0x4a   : > { %1109 = shalt.err (!%p1106_p2)
}
  0x4b   : > { %908 = dma.hbm_to_vmem [thread:$0]  (!%p1401_p8), %s321_s29, 128, %s323_s1, %s311_s20  }
  0x4c   : > { %s850_s10 = sshll.u32 %s1393_s26, 1  ;;  %s851_s21 = sshll.u32 %s1265_s30, 1 }
  0x4d   : > { %s356_s15 = scalar_lea.hbm %s1574_s2, %s851_s21  ;;  %s352_s16 = scalar_lea.vmem [#allocation7], %s850_s10 }
  0x4e   : > { %s358_s17 = sshll.u32 %s356_s15, 4  ;;  %s360_s11 = sshll.u32 %s352_s16, 4  ;;  %s359_s17 = int_to_ptr.hbm [resolvable:$true] %s358_s17  ;;  %s361_s11 = int_to_ptr.vmem [resolvable:$true] %s360_s11 }
  0x4f   : > { %s1125_s23 = sshra.s32 %s359_s17, 4  ;;  %s1132_s29 = scalar_lea.hbm %s1574_s2, 4  ;;  %s1126_s23 = int_to_ptr.hbm [resolvable:$true] %s1125_s23 }
  0x50   : > { %s1127_s19 = scalar_lea.hbm %s1126_s23, 2  ;;  %p1133_p10 = scmp.lt.s32.totalorder %s1126_s23, %s1574_s2 }
  0x51   : > { %p1128_p4 = scmp.ne.s32.totalorder %s1126_s23, %s1127_s19  ;;  %p1134_p6 = scmp.lt.s32.totalorder %s1132_s29, %s1127_s19 }
  0x53   : > { %p1130_p1 = pnand %p1128_p4, %p1009_p9  ;;  %p1135_p11 = por %p1134_p6, %p1133_p10 }
  0x55   : > { %p1131_p7 = pneg %p1130_p1 }
  0x57   : > { %p1136_p12 = pnand %p1135_p11, %p1131_p7 }
  0x59   : > { %1139 = shalt.err (!%p1136_p12)
}
  0x5a   : > { %914 = dma.hbm_to_vmem [thread:$0]  (!%p1401_p8), %s359_s17, 32, %s361_s11, %s1416_s9  }
  0x5b   : > { %369 = sbr.rel (%p1347_p3) target bundleno = 912 (0x390), region = 48  ;;  %s1484_s27 = sand.u32 (!%p1347_p3), 1, %s1257_s28  }
  0x5c   : > { %s1487_s7 = sshll.u32 (!%p1347_p3), %s1484_s27, 3  ;;  %s372_s10 = scalar_lea.sflag (!%p1347_p3), [#allocation3], %s1484_s27 }
  0x5d   : > { %s375_s21 = scalar_lea.vmem (!%p1347_p3), [#allocation2], %s1487_s7 }
  0x60   : > { %1228 = dma.done.wait (%p1383_p13), %s372_s10, 128  }
  0x61   : > { %1230 = vsyncadd (%p1383_p13), %s372_s10, 4294967168  ;;  %s381_s13 = sand.u32 1, %s1342_s12   ;;  %s385_s14 = scalar_lea.vmem [#allocation5], %s1487_s7 }
  0x62   : > { %s382_s9 = scalar_lea.sflag [#allocation6], %s381_s13 }
  0x63   : > { %1232 = dma.done.wait (%p1383_p13), %s382_s9, 160  }
  0x64   : > { %1234 = vsyncadd (%p1383_p13), %s382_s9, 4294967136  ;;  %s855_s18 = sshll.u32 %s1484_s27, 1  ;;  %p1612_p3 = scmp.eq.s32.totalorder %s1342_s12, 0 }
  0x65   : > { %s395_s22 = scalar_lea.vmem [#allocation7], %s855_s18 }
  0x66   : > { %1236 = dma.done.wait (%p1612_p3), [#allocation9], 1024   ;;  %p1613_p8 = pmov %p1612_p3 }
  0x67   : > { %p1614_p9 = pmov %p1612_p3 }
  0x68   : > { %1238 = vsyncadd (%p1613_p8), [#allocation9], 4294966272 }
  0x69   : > { %1240 = dma.done.wait (%p1614_p9), [#allocation12], 512   ;;  %p1615_p2 = pmov %p1612_p3 }
  0x6a   : > { %v467_v0 = vld [vmem:[#allocation8 + $0x18] sm:$0xff]  ;;  %v466_v1 = vld [vmem:[#allocation8 + $0x10] sm:$0xff]  ;;  %v465_v3 = vld [vmem:[#allocation8 + $0x8] sm:$0xff]  ;;  %vm468_vm0 = vcmask 261120   ;;  %v1272_v8 = vmov 0   ;;  %vm523_vm3 = vcmask 64512  }
  0x6b   : > { %1242 = vsyncadd (%p1615_p2), [#allocation12], 4294966784  ;;  %484 = vmatpush.msra.mxu0 %v467_v0  ;;  %v462_v2 = vld [vmem:[%s385_s14] sm:$0xff]  ;;  %v464_v4 = vld [vmem:[#allocation8] sm:$0xff]  ;;  %s458_s24 = scalar_lea.vmem [#allocation14], %s1487_s7  ;;  %s869_s15 = sshll.u32 %s1342_s12, 3 }
  0x6c   : > { %567 = vmatpush.msra.mxu2 %v462_v2  ;;  %v461_v6 = vld [vmem:[%s375_s21] sm:$0xff]  ;;  %v574_v21 = vld [vmem:[#allocation10 + $0x10] sm:$0xff]  ;;  %s660_s11 = scalar_lea.hbm %s1580_s8, %s869_s15  ;;  %s662_s23 = sshll.u32 %s458_s24, 4  ;;  %s663_s23 = int_to_ptr.vmem [resolvable:$true] %s662_s23 }
  0x6d   : > { %485 = vmatpush.msra.mxu0 %v466_v1  ;;  %v463_v7 = vld [vmem:[%s395_s22] sm:$0x3]  ;;  %v578_v22 = vld [vmem:[#allocation11 + $0x10] sm:$0xff]  ;;  %v573_v23 = vld [vmem:[#allocation10 + $0x8] sm:$0xff]  ;;  %s664_s19 = sshll.u32 %s660_s11, 4  ;;  %s636_s1 = scalar_lea.sflag [#allocation15], %s1484_s27  ;;  %s665_s19 = int_to_ptr.hbm [resolvable:$true] %s664_s19 }
  0x6e   : > { %vm518_vm1 = vnez %v463_v7  ;;  %v575_v19 = vld [vmem:[#allocation10 + $0x18] sm:$0xff]  ;;  %v577_v24 = vld [vmem:[#allocation11 + $0x8] sm:$0xff]  ;;  %v572_v25 = vld [vmem:[#allocation10] sm:$0xff]  ;;  %s1169_s26 = sshra.s32 %s665_s19, 4  ;;  %s1175_s12 = scalar_lea.hbm %s1580_s8, 16  ;;  %s1170_s26 = int_to_ptr.hbm [resolvable:$true] %s1169_s26 }
  0x6f   : > { %486 = vmatpush.msra.mxu0 %v465_v3  ;;  %v519_v9 = vsel %vm518_vm1, 16843009, %v1272_v8  ;;  %v579_v20 = vld [vmem:[#allocation11 + $0x18] sm:$0xff]  ;;  %615 = vmatpush.msrb.mxu2 %v575_v19  ;;  %v576_v38 = vld [vmem:[#allocation11] sm:$0xff]  ;;  %s1171_s29 = scalar_lea.hbm %s1170_s26, 8  ;;  %p1176_p7 = scmp.lt.s32.totalorder %s1170_s26, %s1580_s8 }
  0x70   : > { %v520_v10 = vunpack.c.0.s8 %v519_v9  ;;  %592 = vmatpush.msra.mxu3 %v579_v20  ;;  %p1172_p13 = scmp.ne.s32.totalorder %s1170_s26, %s1171_s29  ;;  %p1177_p10 = scmp.lt.s32.totalorder %s1175_s12, %s1171_s29 }
  0x71   : > { %487 = vmatpush.msra.mxu0 %v464_v4  ;;  %616 = vmatpush.msrb.mxu2 %v574_v21 }
  0x72   : > { %861 = vmatmul.msk.f32.vlgmr.msra.gmra.mxu0 %vm468_vm0, %v462_v2  ;;  %vm521_vm2 = vcmp.ne.s32.totalorder %v520_v10, 0  ;;  %593 = vmatpush.msra.mxu3 %v578_v22  ;;  %p1173_p4 = pnand %p1172_p13, %p1387_p0  ;;  %p1178_p6 = por %p1177_p10, %p1176_p7 }
  0x73   : > { %617 = vmatpush.msrb.mxu2 %v573_v23 }
  0x74   : > { %594 = vmatpush.msra.mxu3 %v577_v24  ;;  %p1174_p1 = pneg %p1173_p4 }
  0x75   : > { %618 = vmatpush.msrb.mxu2 %v572_v25 }
  0x76   : > { %595 = vmatpush.msra.mxu3 %v576_v38  ;;  %p1179_p11 = pnand %p1178_p6, %p1174_p1 }
  0x77   : > { %865 = vmatmul.msk.f32.vlgmr.msra.gmra.mxu3 %vm468_vm0, %v461_v6 }
  0xef   : > { %v489_v5 = vpop.f32.mrf.mxu0 }
  0xf0   : > { %862 = vmatpush.xpose.msk.msra.mxu1 %vm468_vm0, %v489_v5 }
  0xf3   : > { %863 = vmatmul.msk.f32.vlgmr.msra.gmra.mxu1 %vm468_vm0, %v461_v6 }
 0x170   : > { %v515_v11 = vpop.f32.mrf.mxu1 }
 0x171   : > { %v522_v12 = vsel %vm521_vm2, -1000000.0, %v515_v11 }
 0x172   : > { %v524_v13 = vsel %vm523_vm3, %v522_v12, -inf }
 0x173   : > { %525 = vmax.xlane.f32.xlu0 %v524_v13 }
 0x1e6   : > { %v526_v14 = vpop.xlane.xlu0 %525 }
 0x1e7   : > { %v527_v15 = vsub.f32 %v522_v12, %v526_v14 }
 0x1e9   : > { %v528_v16 = vmul.f32 1.442695, %v527_v15 }
 0x1eb   : > { %969 = vpow2.f32 %v528_v16 }
 0x1f1   : > { %v970_v17 = vpop.eup %969 }
 0x1f2   : > { %v530_v18 = vsel %vm523_vm3, %v970_v17, 0.0 }
 0x1f3   : > { %531 = vadd.xlane.f32.xlu0 %v530_v18 }
 0x266   : > { %v532_v26 = vpop.xlane.xlu0 %531 }
 0x267   : > { %971 = vrcp.f32 %v532_v26  ;;  %v544_v30 = vand.u32 2147483648, %v532_v26  ;;  %v542_v32 = vand.u32 2147483647, %v532_v26  ;;  %vm538_vm5 = vweird.f32 %v532_v26 }
 0x269   : > { %v545_v34 = vor.u32 1.1754944e-38, %v544_v30  ;;  %vm543_vm7 = vcmp.eq.f32.partialorder %v542_v32, 8.507059e+37 }
 0x26d   : > { %v972_v27 = vpop.eup %971 }
 0x26e   : > { %v534_v28 = vmul.f32 %v972_v27, %v532_v26  ;;  %vm539_vm4 = vweird.f32 %v972_v27 }
 0x26f   : > { %vm540_vm6 = vmor %vm538_vm5, %vm539_vm4 }
 0x270   : > { %v535_v29 = vsub.f32 1.0, %v534_v28 }
 0x272   : > { %v536_v31 = vmul.f32 %v972_v27, %v535_v29 }
 0x274   : > { %v537_v33 = vadd.f32 %v972_v27, %v536_v31 }
 0x276   : > { %v541_v35 = vsel %vm540_vm6, %v972_v27, %v537_v33 }
 0x277   : > { %v546_v36 = vsel %vm543_vm7, %v545_v34, %v541_v35 }
 0x278   : > { %v547_v37 = vmul.f32 %v970_v17, %v546_v36 }
 0x27a   : > { %864 = vmatmul.msk.f32.vlgmr.msra.gmra.mxu2 %vm523_vm3, %v547_v37  ;;  %548 = vst.msk [vmem:[%s458_s24] sm:$0xff] %vm523_vm3, %v547_v37 }
 0x2fd   : > { %v569_v39 = vpop.f32.mrf.mxu2 }
 0x2fe   : > { %866 = vmatmul.msk.f32.vlgmr.msrb.gmra.mxu2 %vm468_vm0, %v569_v39 }
 0x2ff   : > { %1182 = shalt.err (!%p1179_p11)
}
 0x300   : > { %892 = dma.vmem_to_hbm [thread:$0]  (%p1387_p0), %s663_s23, 128, %s665_s19, %s636_s1   ;;  %v597_v40 = vpop.f32.mrf.mxu3  ;;  %v968_v41 = vld [vmem:[%s1578_s6] ss:$0 sm:$0xff] }
 0x301   : > { %s1616_s22 = sld [smem:[#allocation29_spill]]  ;;  %s451_s17 = scalar_lea.vmem [#allocation13], %s1487_s7 }
 0x302   : > { %s648_s16 = sshll.u32 %s451_s17, 4  ;;  %s631_s23 = scalar_lea.sflag [#allocation4], %s1484_s27  ;;  %s649_s16 = int_to_ptr.vmem [resolvable:$true] %s648_s16 }
 0x307   : > { %s646_s24 = scalar_lea.hbm %s1616_s22, %s869_s15  ;;  %s1203_s15 = scalar_lea.hbm %s1616_s22, 16 }
 0x308   : > { %s650_s11 = sshll.u32 %s646_s24, 4  ;;  %s651_s11 = int_to_ptr.hbm [resolvable:$true] %s650_s11 }
 0x309   : > { %s1197_s19 = sshra.s32 %s651_s11, 4  ;;  %s1198_s19 = int_to_ptr.hbm [resolvable:$true] %s1197_s19 }
 0x30a   : > { %s1199_s1 = scalar_lea.hbm %s1198_s19, 8  ;;  %p1204_p9 = scmp.lt.s32.totalorder %s1198_s19, %s1616_s22 }
 0x30b   : > { %p1200_p12 = scmp.ne.s32.totalorder %s1198_s19, %s1199_s1  ;;  %p1205_p2 = scmp.lt.s32.totalorder %s1203_s15, %s1199_s1 }
 0x30d   : > { %p1201_p3 = pnand %p1200_p12, %p1387_p0  ;;  %p1206_p13 = por %p1205_p2, %p1204_p9 }
 0x30f   : > { %p1202_p8 = pneg %p1201_p3 }
 0x311   : > { %p1207_p4 = pnand %p1206_p13, %p1202_p8 }
 0x381   : > { %v620_v42 = vpop.f32.mrf.mxu2 }
 0x382   : > { %v621_v43 = vadd.f32 %v620_v42, %v597_v40 }
 0x384   : > { %v627_v44 = vadd.f32 %v968_v41, %v621_v43 }
 0x386   : > { %973 = vtanh.f32 %v627_v44 }
 0x38c   : > { %v974_v45 = vpop.eup %973 }
 0x38d   : > { %629 = vst.msk [vmem:[%s451_s17] sm:$0xff] %vm468_vm0, %v974_v45 }
 0x38e   : > { %1210 = shalt.err (!%p1207_p4)
}
 0x38f   : > { %891 = dma.vmem_to_hbm [thread:$0]  (%p1387_p0), %s649_s16, 128, %s651_s11, %s631_s23  }
 0x390 PF: > { %s1617_s27 = sld [smem:[#allocation22_spill]]  ;;  %p1619_p1 = scmp.ge.s32.totalorder %s1265_s30, 2 }
 0x392   : > { %p916_p7 = pnand %p1619_p1, %p1395_p5 }
 0x394   : > { %p917_p10 = pneg %p916_p7 }
 0x396   : > { %s676_s12 = sand.u32 1, %s1617_s27  }
 0x397   : > { %s677_s10 = scalar_lea.sflag [#allocation4], %s676_s12 }
 0x398   : > { %1244 = dma.done.wait (%p917_p10), %s677_s10, 128  }
 0x399   : > { %1246 = vsyncadd (%p917_p10), %s677_s10, 4294967168  ;;  %s687_s21 = scalar_lea.sflag [#allocation15], %s676_s12 }
 0x39a   : > { %1248 = dma.done.wait (%p917_p10), %s687_s21, 128  }
 0x39b   : > { %1250 = vsyncadd (%p917_p10), %s687_s21, 4294967168  ;;  %s1620_s30 = sld [smem:[#allocation24_spill]]  ;;  %s1623_s27 = smov %s1257_s28 }
 0x39c   : > { %s1621_s13 = sld [smem:[#allocation23_spill]] }
 0x39d   : > { %s1622_s29 = sld [smem:[#allocation25_spill]] }
 0x3a1   : > { %p30_p0 = scmp.ge.s32.totalorder %s1620_s30, 4  }
 0x3a2   : > { %s1624_s28 = smov %s1621_s13 }
 0x3a3   :  { %32 = sbr.rel (!%p30_p0) target bundleno = 15 (0xf), region = 146 }
 0x3a8   :  { %693 = vsyncpa [#allocation3], 1 }
 0x3a9   :  { %695 = vsyncpa [#allocation3 + $0x1], 1 }
 0x3aa   :  { %696 = vsyncpa [#allocation6], 1 }
 0x3ab   :  { %698 = vsyncpa [#allocation6 + $0x1], 1 }
 0x3ac   :  { %699 = vsyncpa [#allocation9], 1 }
 0x3ad   :  { %700 = vsyncpa [#allocation12], 1 }
 0x3ae   :  { %701 = vsyncpa [#allocation4], 1 }
 0x3af   :  { %703 = vsyncpa [#allocation4 + $0x1], 1 }
 0x3b0   :  { %704 = vsyncpa [#allocation15], 1 }
 0x3b1   :  { %706 = vsyncpa [#allocation15 + $0x1], 1 }

</bundles_post_ra>
